<compile_context>
chip_gen: v7x
topology: tpu7x:2x2x1
jax: 0.10.0
libtpu: 0.0.40
codegen_flags: <defaults>
</compile_context>

<pallas_src>
import jax
import jax.numpy as jnp
from jax.experimental import pallas as pl
from jax.experimental.pallas import tpu as pltpu

LANE = 128
SUBLANE = 8
MAX_TCHUNK = 32          # max timesteps unrolled per grid step


def _round_up(x, m):
    return (x + m - 1) // m * m


def _pick_tchunk(t_steps, max_tchunk):
    """Largest divisor of t_steps that is <= max_tchunk (falls back to 1)."""
    for cand in range(min(t_steps, max_tchunk), 0, -1):
        if t_steps % cand == 0:
            return cand
    return 1


def fused_lstm_kernel(xs_ref, h0_ref, c0_ref, w_ih_ref, w_hh_ref, b_ref,
                      h_out_ref, c_out_ref, px_sc, h_sc, c_sc):
    """One grid step == one chunk of TCHUNK timesteps.

    xs_ref   : [1, TCHUNK*Bp, Dp]   chunk inputs, (t, b) rows flattened
    h0_ref   : [Bp, Hp]             initial hidden state (padded)
    c0_ref   : [Bp, Hp]             initial cell state   (padded)
    w_ih_ref : [Dp, 4*Hp]  bf16     W_ih^T, gate-major 128-lane padded cols
    w_hh_ref : [Hp, 4*Hp]  bf16     W_hh^T, same column layout
    b_ref    : [1, 4*Hp]   f32      combined bias (b_ih + b_hh)
    h_out_ref, c_out_ref : [Bp, Hp] f32   written on the final chunk only
    px_sc    : [TCHUNK*Bp, 4*Hp] f32   batched input projection (+bias)
    h_sc, c_sc : [Bp, Hp] f32          cross-chunk state carry
    """
    bp, hp = h_sc.shape
    tchunk = xs_ref.shape[1] // bp

    # ---- Phase 1: one batched MXU matmul for the whole chunk (M = T*Bp) ----
    # Combined bias folded in here, i.e. hoisted out of the serial loop.
    px_sc[...] = jnp.dot(xs_ref[0].astype(jnp.bfloat16), w_ih_ref[...],
                         preferred_element_type=jnp.float32) + b_ref[...]

    @pl.when(pl.program_id(0) == 0)
    def _init():
        h_sc[...] = h0_ref[...]
        c_sc[...] = c0_ref[...]

    # ---- Phase 2: serial recurrence -- only h @ W_hh^T per step (K = Hp) ----
    h = h_sc[...]
    c = c_sc[...]
    for t in range(tchunk):                 # small static unroll (tchunk<=32)
        gates = px_sc[pl.ds(t * bp, bp), :] + jnp.dot(
            h.astype(jnp.bfloat16), w_hh_ref[...],
            preferred_element_type=jnp.float32)
        # Each gate occupies its own 128-lane-aligned column block, so these
        # slices are whole-vreg reads (no masked / cross-lane extraction).
        i_g = jax.nn.sigmoid(gates[:, 0 * hp:1 * hp])
        f_g = jax.nn.sigmoid(gates[:, 1 * hp:2 * hp])
        g_g = jnp.tanh(gates[:, 2 * hp:3 * hp])
        o_g = jax.nn.sigmoid(gates[:, 3 * hp:4 * hp])
        c = f_g * c + i_g * g_g
        h = o_g * jnp.tanh(c)

    # Carry state in VMEM scratch across grid iterations (chunks).
    h_sc[...] = h
    c_sc[...] = c

    @pl.when(pl.program_id(0) == pl.num_programs(0) - 1)
    def _emit():
        h_out_ref[...] = h.astype(h_out_ref.dtype)
        c_out_ref[...] = c.astype(c_out_ref.dtype)


def prepare_params(w_ih, w_hh, b_ih, b_hh, *, weight_dtype=jnp.bfloat16):
    """One-time (hoisted) parameter re-layout.  Do NOT call per step.

    w_ih : [4H, D], w_hh : [4H, H], b_ih/b_hh : [4H]  (PyTorch LSTMCell layout)
    Produces transposed, gate-major, 128-lane-padded weight slabs (bf16 by
    default) and a combined f32 bias.
    """
    four_h, d = w_ih.shape
    h = four_h // 4
    dp = _round_up(d, LANE)
    hp = _round_up(h, LANE)

    wi = jnp.zeros((dp, 4 * hp), jnp.float32)
    wh = jnp.zeros((hp, 4 * hp), jnp.float32)
    b = jnp.zeros((1, 4 * hp), jnp.float32)
    for g in range(4):
        wi = wi.at[0:d, g * hp:g * hp + h].set(w_ih[g * h:(g + 1) * h, :].T)
        wh = wh.at[0:h, g * hp:g * hp + h].set(w_hh[g * h:(g + 1) * h, :].T)
        b = b.at[0, g * hp:g * hp + h].set(
            b_ih[g * h:(g + 1) * h] + b_hh[g * h:(g + 1) * h])

    return {"w_ih": wi.astype(weight_dtype), "w_hh": wh.astype(weight_dtype),
            "b": b, "input_size": d, "hidden_size": h, "dp": dp, "hp": hp}


def prediction_network_sequence(xs, h0, c0, params, *, max_tchunk=MAX_TCHUNK):
    """Run T LSTMCell steps with the time loop fused inside the kernel.

    xs : [T, B, input_size] float32;  h0/c0 : [B, hidden_size] float32.
    Returns (h_T, c_T), each [B, hidden_size] float32.
    """
    t_steps, batch, d = xs.shape
    h = params["hidden_size"]
    dp, hp = params["dp"], params["hp"]
    assert d == params["input_size"] and h0.shape[-1] == h

    bp = _round_up(batch, SUBLANE)
    tchunk = _pick_tchunk(t_steps, max_tchunk)
    num_chunks = t_steps // tchunk

    # Pad batch/lane dims once, then flatten (t, b) rows inside each chunk so
    # the kernel sees one lane-dense 2-D slab per chunk.
    xs_p = jnp.pad(xs, ((0, 0), (0, bp - batch), (0, dp - d)))
    xs_p = xs_p.reshape(num_chunks, tchunk * bp, dp)
    h0_p = jnp.pad(h0, ((0, bp - batch), (0, hp - h)))
    c0_p = jnp.pad(c0, ((0, bp - batch), (0, hp - h)))

    w_bytes = ((params["w_ih"].size + params["w_hh"].size)
               * params["w_ih"].dtype.itemsize)
    # Single-buffer the constant, never-refetched weight blocks only when they
    # are large enough to matter for VMEM (v7x: 64 MiB, v5e: 16 MiB scoped).
    buffered = pl.Buffered(1) if w_bytes > (4 << 20) else None

    def _const_spec(shape):
        if buffered is None:
            return pl.BlockSpec(shape, lambda c: (0, 0))
        return pl.BlockSpec(shape, lambda c: (0, 0), pipeline_mode=buffered)

    vmem_bytes = (
        2 * tchunk * bp * dp * 4            # xs chunk (double-buffered, f32)
        + tchunk * bp * 4 * hp * 4          # px scratch (f32)
        + 2 * w_bytes                       # weight slabs
        + 2 * 4 * hp * 4                    # bias
        + 8 * bp * hp * 4                   # h0/c0/outputs/state scratch
    )
    vmem_limit = int(min(max(2 * vmem_bytes + (1 << 20), 16 << 20), 64 << 20))

    out_shape = (jax.ShapeDtypeStruct((bp, hp), jnp.float32),
                 jax.ShapeDtypeStruct((bp, hp), jnp.float32))

    h1p, c1p = pl.pallas_call(
        fused_lstm_kernel,
        out_shape=out_shape,
        grid_spec=pltpu.PrefetchScalarGridSpec(
            num_scalar_prefetch=0,
            grid=(num_chunks,),
            in_specs=[
                # Per-chunk input: new block each grid iteration.
                pl.BlockSpec((1, tchunk * bp, dp), lambda c: (c, 0, 0)),
                # Initial state + weights + bias: constant index -> loaded
                # once, VMEM-resident for the whole recurrence.
                _const_spec((bp, hp)),
                _const_spec((bp, hp)),
                _const_spec((dp, 4 * hp)),
                _const_spec((hp, 4 * hp)),
                _const_spec((1, 4 * hp)),
            ],
            out_specs=(
                pl.BlockSpec((bp, hp), lambda c: (0, 0)),
                pl.BlockSpec((bp, hp), lambda c: (0, 0)),
            ),
            scratch_shapes=[
                pltpu.VMEM((tchunk * bp, 4 * hp), jnp.float32),  # px (x@W_ih+b)
                pltpu.VMEM((bp, hp), jnp.float32),               # h carry
                pltpu.VMEM((bp, hp), jnp.float32),               # c carry
            ],
        ),
        compiler_params=pltpu.CompilerParams(
            # The chunk axis is a sequential recurrence.
            dimension_semantics=("arbitrary",),
            vmem_limit_bytes=vmem_limit),
    )(xs_p, h0_p, c0_p, params["w_ih"], params["w_hh"], params["b"])

    return h1p[:batch, :h], c1p[:batch, :h]


def prediction_network_cell(x, hx, params, dropout_ratio: float = 0.0):
    """Module-equivalent single-step forward: returns (h_1, c_1)."""
    # dropout_ratio == 0.0 -> nn.Dropout is None in the reference module.
    # TODO(synk): nonzero training-mode dropout would need a pltpu.prng_*
    # based mask applied to x before the input projection.
    del dropout_ratio
    h0, c0 = hx
    return prediction_network_sequence(x[None], h0, c0, params)


# ----------------------------- references ----------------------------------

def _reference_step(x, h0, c0, w_ih, w_hh, b_ih, b_hh):
    gates = x @ w_ih.T + b_ih + h0 @ w_hh.T + b_hh
    h = h0.shape[-1]
    i = jax.nn.sigmoid(gates[:, 0 * h:1 * h])
    f = jax.nn.sigmoid(gates[:, 1 * h:2 * h])
    g = jnp.tanh(gates[:, 2 * h:3 * h])
    o = jax.nn.sigmoid(gates[:, 3 * h:4 * h])
    c1 = f * c0 + i * g
    h1 = o * jnp.tanh(c1)
    return h1, c1


def _reference_sequence(xs, h0, c0, w_ih, w_hh, b_ih, b_hh):
    h, c = h0, c0
    for t in range(xs.shape[0]):
        h, c = _reference_step(xs[t], h, c, w_ih, w_hh, b_ih, b_hh)
    return h, c


if __name__ == "__main__":
    key = jax.random.PRNGKey(0)
    batch, input_size, hidden_size, seq = 2, 32, 32, 8

    k = jax.random.split(key, 7)
    bound = 1.0 / jnp.sqrt(hidden_size)
    # PyTorch-style uniform(-1/sqrt(H), 1/sqrt(H)) parameter init.
    w_ih = jax.random.uniform(k[0], (4 * hidden_size, input_size),
                              jnp.float32, -bound, bound)
    w_hh = jax.random.uniform(k[1], (4 * hidden_size, hidden_size),
                              jnp.float32, -bound, bound)
    b_ih = jax.random.uniform(k[2], (4 * hidden_size,), jnp.float32, -bound, bound)
    b_hh = jax.random.uniform(k[3], (4 * hidden_size,), jnp.float32, -bound, bound)

    xs = jax.random.normal(k[4], (seq, batch, input_size), jnp.float32)
    h0 = jax.random.normal(k[5], (batch, hidden_size), jnp.float32)
    c0 = jax.random.normal(k[6], (batch, hidden_size), jnp.float32)

    # Hoisted: transpose / stack / bias-combine / pad / bf16 cast exactly once.
    params = prepare_params(w_ih, w_hh, b_ih, b_hh)

    # --- single-step call: exact module forward (T = 1) ---
    h1, c1 = prediction_network_cell(xs[0], (h0, c0), params, dropout_ratio=0.0)
    jax.block_until_ready((h1, c1))
    h1_ref, c1_ref = _reference_step(xs[0], h0, c0, w_ih, w_hh, b_ih, b_hh)
    # bf16 matmul operands (f32 accumulation) -> slightly looser tolerance.
    assert jnp.allclose(h1, h1_ref, atol=2e-2, rtol=2e-2), "single-step h mismatch"
    assert jnp.allclose(c1, c1_ref, atol=2e-2, rtol=2e-2), "single-step c mismatch"

    # --- fused T-step recurrence: time loop inside one pallas_call ---
    hT, cT = prediction_network_sequence(xs, h0, c0, params)
    jax.block_until_ready((hT, cT))
    hT_ref, cT_ref = _reference_sequence(xs, h0, c0, w_ih, w_hh, b_ih, b_hh)
    assert jnp.allclose(hT, hT_ref, atol=5e-2, rtol=5e-2), "sequence h mismatch"
    assert jnp.allclose(cT, cT_ref, atol=5e-2, rtol=5e-2), "sequence c mismatch"

    # --- multi-chunk path (grid > 1): exercises cross-chunk h/c carry ---
    hT2, cT2 = prediction_network_sequence(xs, h0, c0, params, max_tchunk=2)
    jax.block_until_ready((hT2, cT2))
    assert jnp.allclose(hT2, hT_ref, atol=5e-2, rtol=5e-2), "chunked h mismatch"
    assert jnp.allclose(cT2, cT_ref, atol=5e-2, rtol=5e-2), "chunked c mismatch"

    print("KERNEL_OK")
</pallas_src>

<mosaic_0001>
module attributes {stable_mosaic.version = 11 : i64} {
  func.func @fused_lstm_kernel(%arg0: i32, %arg1: memref<1x8x128xf32, #tpu.memory_space<vmem>>, %arg2: memref<8x128xf32, #tpu.memory_space<vmem>>, %arg3: memref<8x128xf32, #tpu.memory_space<vmem>>, %arg4: memref<128x512xbf16, #tpu.memory_space<vmem>>, %arg5: memref<128x512xbf16, #tpu.memory_space<vmem>>, %arg6: memref<1x512xf32, #tpu.memory_space<vmem>>, %arg7: memref<8x128xf32, #tpu.memory_space<vmem>>, %arg8: memref<8x128xf32, #tpu.memory_space<vmem>>, %arg9: memref<8x512xf32, #tpu.memory_space<vmem>>, %arg10: memref<8x128xf32, #tpu.memory_space<vmem>>, %arg11: memref<8x128xf32, #tpu.memory_space<vmem>>) attributes {dimension_semantics = [#tpu.dimension_semantics<arbitrary>], iteration_bounds = array<i64: 1>, scalar_prefetch = 0 : i64, scratch_operands = 3 : i64, tpu.core_type = #tpu.core_type<tc>, window_params = [{transform_indices = @transform_0, window_bounds = array<i64: 1, 8, 128>}, {pipeline_mode = #tpu.pipeline_mode<synchronous>, transform_indices = @transform_1, window_bounds = array<i64: 8, 128>}, {pipeline_mode = #tpu.pipeline_mode<synchronous>, transform_indices = @transform_2, window_bounds = array<i64: 8, 128>}, {pipeline_mode = #tpu.pipeline_mode<synchronous>, transform_indices = @transform_3, window_bounds = array<i64: 128, 512>}, {pipeline_mode = #tpu.pipeline_mode<synchronous>, transform_indices = @transform_4, window_bounds = array<i64: 128, 512>}, {pipeline_mode = #tpu.pipeline_mode<synchronous>, transform_indices = @transform_5, window_bounds = array<i64: 1, 512>}, {pipeline_mode = #tpu.pipeline_mode<synchronous>, transform_indices = @transform_6, window_bounds = array<i64: 8, 128>}, {pipeline_mode = #tpu.pipeline_mode<synchronous>, transform_indices = @transform_7, window_bounds = array<i64: 8, 128>}]} {
    %c0 = arith.constant 0 : index
    %c0_0 = arith.constant 0 : index
    %c0_1 = arith.constant 0 : index
    %0 = vector.load %arg1[%c0, %c0_0, %c0_1] : memref<1x8x128xf32, #tpu.memory_space<vmem>>, vector<1x8x128xf32>
    %1 = vector.shape_cast %0 : vector<1x8x128xf32> to vector<8x128xf32>
    %2 = arith.truncf %1 : vector<8x128xf32> to vector<8x128xbf16>
    %c0_2 = arith.constant 0 : index
    %c0_3 = arith.constant 0 : index
    %3 = vector.load %arg4[%c0_2, %c0_3] : memref<128x512xbf16, #tpu.memory_space<vmem>>, vector<128x512xbf16>
    %cst = arith.constant dense<0.000000e+00> : vector<8x512xf32>
    %4 = tpu.matmul %2, %3, %cst {dimension_numbers = #tpu.dot_dimension_numbers<[1], [0], [0], [1], [0, 0, 1, 1], [], []>} : vector<8x128xbf16>, vector<128x512xbf16>, vector<8x512xf32> -> vector<8x512xf32>
    %c0_4 = arith.constant 0 : index
    %c0_5 = arith.constant 0 : index
    %5 = vector.load %arg6[%c0_4, %c0_5] : memref<1x512xf32, #tpu.memory_space<vmem>>, vector<1x512xf32>
    %6 = vector.broadcast %5 : vector<1x512xf32> to vector<8x512xf32>
    %7 = arith.addf %4, %6 : vector<8x512xf32>
    %c0_6 = arith.constant 0 : index
    %c0_7 = arith.constant 0 : index
    %8 = vector.load %arg9[%c0_6, %c0_7] : memref<8x512xf32, #tpu.memory_space<vmem>>, vector<8x512xf32>
    tpu.vector_store %arg9[%c0_6, %c0_7], %7 {strides = array<i32>} : memref<8x512xf32, #tpu.memory_space<vmem>>, vector<8x512xf32>,
    %c0_i32 = arith.constant 0 : i32
    %9 = arith.cmpi eq, %arg0, %c0_i32 : i32
    %10 = arith.extui %9 : i1 to i32
    %c0_i32_8 = arith.constant 0 : i32
    %11 = arith.cmpi ne, %10, %c0_i32_8 : i32
    scf.if %11 {
      %c0_27 = arith.constant 0 : index
      %c0_28 = arith.constant 0 : index
      %49 = vector.load %arg2[%c0_27, %c0_28] : memref<8x128xf32, #tpu.memory_space<vmem>>, vector<8x128xf32>
      %c0_29 = arith.constant 0 : index
      %c0_30 = arith.constant 0 : index
      %50 = vector.load %arg10[%c0_29, %c0_30] : memref<8x128xf32, #tpu.memory_space<vmem>>, vector<8x128xf32>
      tpu.vector_store %arg10[%c0_29, %c0_30], %49 {strides = array<i32>} : memref<8x128xf32, #tpu.memory_space<vmem>>, vector<8x128xf32>,
      %c0_31 = arith.constant 0 : index
      %c0_32 = arith.constant 0 : index
      %51 = vector.load %arg3[%c0_31, %c0_32] : memref<8x128xf32, #tpu.memory_space<vmem>>, vector<8x128xf32>
      %c0_33 = arith.constant 0 : index
      %c0_34 = arith.constant 0 : index
      %52 = vector.load %arg11[%c0_33, %c0_34] : memref<8x128xf32, #tpu.memory_space<vmem>>, vector<8x128xf32>
      tpu.vector_store %arg11[%c0_33, %c0_34], %51 {strides = array<i32>} : memref<8x128xf32, #tpu.memory_space<vmem>>, vector<8x128xf32>,
    } else {
    }
    %c0_9 = arith.constant 0 : index
    %c0_10 = arith.constant 0 : index
    %12 = vector.load %arg10[%c0_9, %c0_10] : memref<8x128xf32, #tpu.memory_space<vmem>>, vector<8x128xf32>
    %c0_11 = arith.constant 0 : index
    %c0_12 = arith.constant 0 : index
    %13 = vector.load %arg11[%c0_11, %c0_12] : memref<8x128xf32, #tpu.memory_space<vmem>>, vector<8x128xf32>
    %c0_13 = arith.constant 0 : index
    %c0_14 = arith.constant 0 : index
    %14 = vector.load %arg9[%c0_13, %c0_14] : memref<8x512xf32, #tpu.memory_space<vmem>>, vector<8x512xf32>
    %15 = arith.truncf %12 : vector<8x128xf32> to vector<8x128xbf16>
    %c0_15 = arith.constant 0 : index
    %c0_16 = arith.constant 0 : index
    %16 = vector.load %arg5[%c0_15, %c0_16] : memref<128x512xbf16, #tpu.memory_space<vmem>>, vector<128x512xbf16>
    %cst_17 = arith.constant dense<0.000000e+00> : vector<8x512xf32>
    %17 = tpu.matmul %15, %16, %cst_17 {dimension_numbers = #tpu.dot_dimension_numbers<[1], [0], [0], [1], [0, 0, 1, 1], [], []>} : vector<8x128xbf16>, vector<128x512xbf16>, vector<8x512xf32> -> vector<8x512xf32>
    %18 = arith.addf %14, %17 : vector<8x512xf32>
    %19 = vector.extract_strided_slice %18 {offsets = [0, 0], sizes = [8, 128], strides = [1, 1]} : vector<8x512xf32> to vector<8x128xf32>
    %20 = arith.negf %19 : vector<8x128xf32>
    %21 = math.exp %20 : vector<8x128xf32>
    %cst_18 = arith.constant 1.000000e+00 : f32
    %22 = vector.broadcast %cst_18 : f32 to vector<8x128xf32>
    %23 = arith.addf %22, %21 : vector<8x128xf32>
    %24 = arith.divf %22, %23 : vector<8x128xf32>
    %25 = vector.extract_strided_slice %18 {offsets = [0, 128], sizes = [8, 128], strides = [1, 1]} : vector<8x512xf32> to vector<8x128xf32>
    %26 = arith.negf %25 : vector<8x128xf32>
    %27 = math.exp %26 : vector<8x128xf32>
    %cst_19 = arith.constant 1.000000e+00 : f32
    %28 = vector.broadcast %cst_19 : f32 to vector<8x128xf32>
    %29 = arith.addf %28, %27 : vector<8x128xf32>
    %30 = arith.divf %28, %29 : vector<8x128xf32>
    %31 = vector.extract_strided_slice %18 {offsets = [0, 256], sizes = [8, 128], strides = [1, 1]} : vector<8x512xf32> to vector<8x128xf32>
    %32 = math.tanh %31 : vector<8x128xf32>
    %33 = vector.extract_strided_slice %18 {offsets = [0, 384], sizes = [8, 128], strides = [1, 1]} : vector<8x512xf32> to vector<8x128xf32>
    %34 = arith.negf %33 : vector<8x128xf32>
    %35 = math.exp %34 : vector<8x128xf32>
    %cst_20 = arith.constant 1.000000e+00 : f32
    %36 = vector.broadcast %cst_20 : f32 to vector<8x128xf32>
    %37 = arith.addf %36, %35 : vector<8x128xf32>
    %38 = arith.divf %36, %37 : vector<8x128xf32>
    %39 = arith.mulf %30, %13 : vector<8x128xf32>
    %40 = arith.mulf %24, %32 : vector<8x128xf32>
    %41 = arith.addf %39, %40 : vector<8x128xf32>
    %42 = math.tanh %41 : vector<8x128xf32>
    %43 = arith.mulf %38, %42 : vector<8x128xf32>
    %c0_21 = arith.constant 0 : index
    %c0_22 = arith.constant 0 : index
    %44 = vector.load %arg10[%c0_21, %c0_22] : memref<8x128xf32, #tpu.memory_space<vmem>>, vector<8x128xf32>
    tpu.vector_store %arg10[%c0_21, %c0_22], %43 {strides = array<i32>} : memref<8x128xf32, #tpu.memory_space<vmem>>, vector<8x128xf32>,
    %c0_23 = arith.constant 0 : index
    %c0_24 = arith.constant 0 : index
    %45 = vector.load %arg11[%c0_23, %c0_24] : memref<8x128xf32, #tpu.memory_space<vmem>>, vector<8x128xf32>
    tpu.vector_store %arg11[%c0_23, %c0_24], %41 {strides = array<i32>} : memref<8x128xf32, #tpu.memory_space<vmem>>, vector<8x128xf32>,
    %c0_i32_25 = arith.constant 0 : i32
    %46 = arith.cmpi eq, %arg0, %c0_i32_25 : i32
    %47 = arith.extui %46 : i1 to i32
    %c0_i32_26 = arith.constant 0 : i32
    %48 = arith.cmpi ne, %47, %c0_i32_26 : i32
    scf.if %48 {
      %c0_27 = arith.constant 0 : index
      %c0_28 = arith.constant 0 : index
      %49 = vector.load %arg7[%c0_27, %c0_28] : memref<8x128xf32, #tpu.memory_space<vmem>>, vector<8x128xf32>
      tpu.vector_store %arg7[%c0_27, %c0_28], %43 {strides = array<i32>} : memref<8x128xf32, #tpu.memory_space<vmem>>, vector<8x128xf32>,
      %c0_29 = arith.constant 0 : index
      %c0_30 = arith.constant 0 : index
      %50 = vector.load %arg8[%c0_29, %c0_30] : memref<8x128xf32, #tpu.memory_space<vmem>>, vector<8x128xf32>
      tpu.vector_store %arg8[%c0_29, %c0_30], %41 {strides = array<i32>} : memref<8x128xf32, #tpu.memory_space<vmem>>, vector<8x128xf32>,
    } else {
    }
    return
  }
  func.func @transform_0(%arg0: i32) -> (i32, i32, i32) {
    %c0_i32 = arith.constant 0 : i32
    %c0_i32_0 = arith.constant 0 : i32
    %c0_i32_1 = arith.constant 0 : i32
    return %arg0, %c0_i32, %c0_i32_0 : i32, i32, i32
  }
  func.func @transform_1(%arg0: i32) -> (i32, i32) {
    %c0_i32 = arith.constant 0 : i32
    %c0_i32_0 = arith.constant 0 : i32
    %c0_i32_1 = arith.constant 0 : i32
    return %c0_i32, %c0_i32_0 : i32, i32
  }
  func.func @transform_2(%arg0: i32) -> (i32, i32) {
    %c0_i32 = arith.constant 0 : i32
    %c0_i32_0 = arith.constant 0 : i32
    %c0_i32_1 = arith.constant 0 : i32
    return %c0_i32, %c0_i32_0 : i32, i32
  }
  func.func @transform_3(%arg0: i32) -> (i32, i32) {
    %c0_i32 = arith.constant 0 : i32
    %c0_i32_0 = arith.constant 0 : i32
    %c0_i32_1 = arith.constant 0 : i32
    return %c0_i32, %c0_i32_0 : i32, i32
  }
  func.func @transform_4(%arg0: i32) -> (i32, i32) {
    %c0_i32 = arith.constant 0 : i32
    %c0_i32_0 = arith.constant 0 : i32
    %c0_i32_1 = arith.constant 0 : i32
    return %c0_i32, %c0_i32_0 : i32, i32
  }
  func.func @transform_5(%arg0: i32) -> (i32, i32) {
    %c0_i32 = arith.constant 0 : i32
    %c0_i32_0 = arith.constant 0 : i32
    %c0_i32_1 = arith.constant 0 : i32
    return %c0_i32, %c0_i32_0 : i32, i32
  }
  func.func @transform_6(%arg0: i32) -> (i32, i32) {
    %c0_i32 = arith.constant 0 : i32
    %c0_i32_0 = arith.constant 0 : i32
    %c0_i32_1 = arith.constant 0 : i32
    return %c0_i32, %c0_i32_0 : i32, i32
  }
  func.func @transform_7(%arg0: i32) -> (i32, i32) {
    %c0_i32 = arith.constant 0 : i32
    %c0_i32_0 = arith.constant 0 : i32
    %c0_i32_1 = arith.constant 0 : i32
    return %c0_i32, %c0_i32_0 : i32, i32
  }
}

</mosaic_0001>

<bundles_post_ra>
// kernel: tpu_custom_call.1
= control target key start
LH: loop header
LB: loop body
LE: loop exit
PB: predicated region body
PF: predicated region fallthrough
CT: control target
= control target key end

     0   :  { %13 = vsyncpa [#allocation6], 0  ;;  %s1266_s0 = inlined_call_operand.hbm [shape: f32[1,8,128], index: 0, kind: input, shape index: {}]   ;;  %s1267_s1 = inlined_call_operand.hbm [shape: f32[8,128], index: 1, kind: input, shape index: {}]   ;;  %s1268_s2 = inlined_call_operand.hbm [shape: f32[8,128], index: 2, kind: input, shape index: {}]   ;;  %s1269_s3 = inlined_call_operand.hbm [shape: bf16[128,512], index: 3, kind: input, shape index: {}]   ;;  %s1270_s4 = inlined_call_operand.hbm [shape: bf16[128,512], index: 4, kind: input, shape index: {}]   ;;  %s1271_s5 = inlined_call_operand.vmem [shape: f32[1,512], index: 5, kind: input, shape index: {}]   ;;  %s1272_s6 = inlined_call_operand.hbm [shape: f32[8,128], index: 6, kind: output, shape index: {0}]   ;;  %s1273_s7 = inlined_call_operand.hbm [shape: f32[8,128], index: 7, kind: output, shape index: {1}]  }
   0x1   :  { %14 = vsyncpa [#allocation9], 0 }
   0x2   :  { %15 = vsyncpa [#allocation12], 0 }
   0x3   :  { %16 = vsyncpa [#allocation7], 0 }
   0x4   :  { %17 = vsyncpa [#allocation16], 0  ;;  %s1112_s24 = smov [#allocation8]   ;;  %s1113_s26 = smov [#allocation11]  }
   0x5   :  { %s34_s25 = sshll.u32 %s1112_s24, 4  ;;  %s53_s27 = sshll.u32 %s1113_s26, 4  ;;  %s35_s25 = int_to_ptr.vmem [resolvable:$true] %s34_s25  ;;  %s1162_s27 = int_to_ptr.vmem [resolvable:$true] %s53_s27 }
   0x6   :  { %s948_s30 = scalar_lea.hbm %s1267_s1, 128 }
   0x7   :  { %p949_p0 = scmp.ne.s32.totalorder %s1267_s1, %s948_s30  ;;  %p952_p1 = scmp.lt.u32.totalorder %s948_s30, %s1267_s1 }
   0x9   :  { %p954_p2 = pnand %p952_p1, %p949_p0 }
   0xb   :  { %957 = shalt.err (!%p954_p2)
}
   0xc   :  { %s958_s12 = scalar_lea.vmem %s35_s25, 128  ;;  %p963_p4 = scmp.lt.s32.totalorder %s35_s25, %s35_s25 }
   0xd   :  { %p959_p3 = scmp.ne.s32.totalorder %s35_s25, %s958_s12  ;;  %p964_p5 = scmp.lt.s32.totalorder %s958_s12, %s958_s12 }
   0xf   :  { %p965_p6 = por %p964_p5, %p963_p4 }
  0x11   :  { %p966_p7 = pnand %p965_p6, %p959_p3 }
  0x13   :  { %969 = shalt.err (!%p966_p7)
}
  0x14   :  { %37 = dma.hbm_to_vmem [thread:$0]  %s1267_s1, 128, %s35_s25, [#allocation9]  }
  0x15   :  { %s970_s17 = scalar_lea.hbm %s1269_s3, 4096 }
  0x16   :  { %p971_p8 = scmp.ne.s32.totalorder %s1269_s3, %s970_s17  ;;  %p974_p9 = scmp.lt.u32.totalorder %s970_s17, %s1269_s3 }
  0x18   :  { %p976_p10 = pnand %p974_p9, %p971_p8 }
  0x1a   :  { %979 = shalt.err (!%p976_p10)
}
  0x1b   :  { %s980_s22 = scalar_lea.vmem %s1162_s27, 4096  ;;  %p985_p12 = scmp.lt.s32.totalorder %s1162_s27, %s1162_s27 }
  0x1c   :  { %p981_p11 = scmp.ne.s32.totalorder %s1162_s27, %s980_s22  ;;  %p986_p13 = scmp.lt.s32.totalorder %s980_s22, %s980_s22 }
  0x1e   :  { %p987_p0 = por %p986_p13, %p985_p12 }
  0x20   :  { %p988_p1 = pnand %p987_p0, %p981_p11 }
  0x22   :  { %991 = shalt.err (!%p988_p1)
}
  0x23   :  { %s1114_s1 = smov 256   ;;  %s1115_s23 = smov 16  }
  0x24   :  { %59 = dma.hbm_to_vmem [thread:$0]  %s1269_s3, 4096, %s1162_s27, [#allocation12], %s1114_s1, %s1114_s1, %s1115_s23  }
  0x25   :  { %s1116_s26 = smov [#allocation5]   ;;  %s1117_s29 = smov [#allocation10]  }
  0x26   :  { %s24_s28 = sshll.u32 %s1116_s26, 4  ;;  %s44_s30 = sshll.u32 %s1117_s29, 4  ;;  %s25_s28 = int_to_ptr.vmem [resolvable:$true] %s24_s28  ;;  %s45_s30 = int_to_ptr.vmem [resolvable:$true] %s44_s30 }
  0x27   :  { %s992_s10 = scalar_lea.hbm %s1266_s0, 128 }
  0x28   :  { %p993_p2 = scmp.ne.s32.totalorder %s1266_s0, %s992_s10  ;;  %p996_p3 = scmp.lt.u32.totalorder %s992_s10, %s1266_s0 }
  0x2a   :  { %p998_p4 = pnand %p996_p3, %p993_p2 }
  0x2c   :  { %1001 = shalt.err (!%p998_p4)
}
  0x2d   :  { %s1002_s3 = scalar_lea.vmem %s25_s28, 128  ;;  %p1007_p6 = scmp.lt.s32.totalorder %s25_s28, %s25_s28 }
  0x2e   :  { %p1003_p5 = scmp.ne.s32.totalorder %s25_s28, %s1002_s3  ;;  %p1008_p7 = scmp.lt.s32.totalorder %s1002_s3, %s1002_s3 }
  0x30   :  { %p1009_p8 = por %p1008_p7, %p1007_p6 }
  0x32   :  { %p1010_p9 = pnand %p1009_p8, %p1003_p5 }
  0x34   :  { %1013 = shalt.err (!%p1010_p9)
}
  0x35   :  { %27 = dma.hbm_to_vmem [thread:$0]  %s1266_s0, 128, %s25_s28, [#allocation6]  }
  0x36   :  { %s1014_s18 = scalar_lea.hbm %s1268_s2, 128 }
  0x37   :  { %p1015_p10 = scmp.ne.s32.totalorder %s1268_s2, %s1014_s18  ;;  %p1018_p11 = scmp.lt.u32.totalorder %s1014_s18, %s1268_s2 }
  0x39   :  { %p1020_p12 = pnand %p1018_p11, %p1015_p10 }
  0x3b   :  { %1023 = shalt.err (!%p1020_p12)
}
  0x3c   :  { %s1024_s24 = scalar_lea.vmem %s45_s30, 128  ;;  %p1029_p0 = scmp.lt.s32.totalorder %s45_s30, %s45_s30 }
  0x3d   :  { %p1025_p13 = scmp.ne.s32.totalorder %s45_s30, %s1024_s24  ;;  %p1030_p1 = scmp.lt.s32.totalorder %s1024_s24, %s1024_s24 }
  0x3f   :  { %p1031_p2 = por %p1030_p1, %p1029_p0 }
  0x41   :  { %p1032_p3 = pnand %p1031_p2, %p1025_p13 }
  0x43   :  { %1035 = shalt.err (!%p1032_p3)
}
  0x44   :  { %47 = dma.hbm_to_vmem [thread:$0]  %s1268_s2, 128, %s45_s30, [#allocation9]  }
  0x45   :  { %s1118_s26 = smov [#allocation13]   ;;  %s1036_s9 = scalar_lea.hbm %s1270_s4, 4096 }
  0x46   :  { %s65_s28 = sshll.u32 %s1118_s26, 4  ;;  %p1037_p4 = scmp.ne.s32.totalorder %s1270_s4, %s1036_s9  ;;  %s66_s28 = int_to_ptr.vmem [resolvable:$true] %s65_s28 }
  0x47   :  { %p1040_p5 = scmp.lt.u32.totalorder %s1036_s9, %s1270_s4 }
  0x49   :  { %p1042_p6 = pnand %p1040_p5, %p1037_p4 }
  0x4b   :  { %1045 = shalt.err (!%p1042_p6)
}
  0x4c   :  { %s1046_s14 = scalar_lea.vmem %s66_s28, 4096  ;;  %p1051_p8 = scmp.lt.s32.totalorder %s66_s28, %s66_s28 }
  0x4d   :  { %p1047_p7 = scmp.ne.s32.totalorder %s66_s28, %s1046_s14  ;;  %p1052_p9 = scmp.lt.s32.totalorder %s1046_s14, %s1046_s14 }
  0x4f   :  { %p1053_p10 = por %p1052_p9, %p1051_p8 }
  0x51   :  { %p1054_p11 = pnand %p1053_p10, %p1047_p7 }
  0x53   :  { %1057 = shalt.err (!%p1054_p11)
}
  0x54   :  { %71 = dma.hbm_to_vmem [thread:$0]  %s1270_s4, 4096, %s66_s28, [#allocation12], %s1114_s1, %s1114_s1, %s1115_s23  }
  0x55   :  { %1102 = dma.done.wait [#allocation6], 128  }
  0x56   :  { %1103 = vsyncadd [#allocation6], 4294967168 }
  0x57   :  { %1104 = dma.done.wait [#allocation9], 256  }
  0x58   :  { %1105 = vsyncadd [#allocation9], 4294967040 }
  0x59   :  { %1106 = dma.done.wait [#allocation12], 8192  }
  0x5a   :  { %1107 = vsyncadd [#allocation12], 4294959104  ;;  %v1119_v0 = vmov 0   ;;  %v836_v1 = vld [vmem:[#allocation11 + $0x4] ss:$16 sps:$4 sm:$0xff]   ;;  %v90_v33 = vld [vmem:[#allocation5] sm:$0xff] }
  0x5b   :  { %338 = vmatprep.mubr.bf16.mxu0 %v1119_v0  ;;  %379 = vmatprep.mubr.bf16.mxu1 %v1119_v0  ;;  %v838_v2 = vld [vmem:[#allocation11 + $0xc] ss:$16 sps:$4 sm:$0xff]   ;;  %v840_v3 = vld [vmem:[#allocation11] ss:$16 sps:$4 sm:$0xff]   ;;  %v841_v4 = vld [vmem:[#allocation11 + $0x8] ss:$16 sps:$4 sm:$0xff]   ;;  %v91_v37 = vpack.c.bf16 %v90_v33, %v90_v33 }
  0x5c   :  { %306 = vmatprep.subr.bf16.mxu0 %v836_v1  ;;  %347 = vmatprep.subr.bf16.mxu1 %v838_v2  ;;  %v842_v5 = vld [vmem:[#allocation11 + $0x24] ss:$16 sps:$4 sm:$0xff]   ;;  %v844_v6 = vld [vmem:[#allocation11 + $0x2c] ss:$16 sps:$4 sm:$0xff]   ;;  %v846_v7 = vld [vmem:[#allocation11 + $0x20] ss:$16 sps:$4 sm:$0xff]  }
  0x5d   :  { %307 = vmatpush1.bf16.msra.mxu0 %v840_v3  ;;  %348 = vmatpush1.bf16.msra.mxu1 %v841_v4  ;;  %v847_v8 = vld [vmem:[#allocation11 + $0x28] ss:$16 sps:$4 sm:$0xff]   ;;  %v848_v9 = vld [vmem:[#allocation11 + $0x44] ss:$16 sps:$4 sm:$0xff]   ;;  %v850_v10 = vld [vmem:[#allocation11 + $0x4c] ss:$16 sps:$4 sm:$0xff]  }
  0x5e   :  { %308 = vmatprep.subr.bf16.mxu0 %v842_v5  ;;  %349 = vmatprep.subr.bf16.mxu1 %v844_v6  ;;  %v852_v11 = vld [vmem:[#allocation11 + $0x40] ss:$16 sps:$4 sm:$0xff]   ;;  %v853_v12 = vld [vmem:[#allocation11 + $0x48] ss:$16 sps:$4 sm:$0xff]   ;;  %v854_v13 = vld [vmem:[#allocation11 + $0x64] ss:$16 sps:$4 sm:$0xff]   ;;  %v126_v5 = vlaneseq }
  0x5f   :  { %v856_v14 = vld [vmem:[#allocation11 + $0x6c] ss:$16 sps:$4 sm:$0xff]   ;;  %v858_v15 = vld [vmem:[#allocation11 + $0x60] ss:$16 sps:$4 sm:$0xff]   ;;  %v859_v16 = vld [vmem:[#allocation11 + $0x68] ss:$16 sps:$4 sm:$0xff]  }
  0x60   :  { %v860_v17 = vld [vmem:[#allocation11 + $0x84] ss:$16 sps:$4 sm:$0xff]   ;;  %v862_v18 = vld [vmem:[#allocation11 + $0x8c] ss:$16 sps:$4 sm:$0xff]   ;;  %v864_v19 = vld [vmem:[#allocation11 + $0x80] ss:$16 sps:$4 sm:$0xff]  }
  0x61   :  { %309 = vmatpush1.bf16.msra.mxu0 %v846_v7  ;;  %350 = vmatpush1.bf16.msra.mxu1 %v847_v8  ;;  %v865_v20 = vld [vmem:[#allocation11 + $0x88] ss:$16 sps:$4 sm:$0xff]   ;;  %v866_v21 = vld [vmem:[#allocation11 + $0xa4] ss:$16 sps:$4 sm:$0xff]   ;;  %v868_v22 = vld [vmem:[#allocation11 + $0xac] ss:$16 sps:$4 sm:$0xff]  }
  0x62   :  { %310 = vmatprep.subr.bf16.mxu0 %v848_v9  ;;  %351 = vmatprep.subr.bf16.mxu1 %v850_v10  ;;  %v870_v23 = vld [vmem:[#allocation11 + $0xa0] ss:$16 sps:$4 sm:$0xff]   ;;  %v871_v24 = vld [vmem:[#allocation11 + $0xa8] ss:$16 sps:$4 sm:$0xff]   ;;  %v872_v25 = vld [vmem:[#allocation11 + $0xc4] ss:$16 sps:$4 sm:$0xff]  }
  0x63   :  { %v874_v26 = vld [vmem:[#allocation11 + $0xcc] ss:$16 sps:$4 sm:$0xff]   ;;  %v876_v27 = vld [vmem:[#allocation11 + $0xc0] ss:$16 sps:$4 sm:$0xff]   ;;  %v877_v28 = vld [vmem:[#allocation11 + $0xc8] ss:$16 sps:$4 sm:$0xff]  }
  0x64   :  { %v878_v29 = vld [vmem:[#allocation11 + $0xe4] ss:$16 sps:$4 sm:$0xff]   ;;  %v880_v30 = vld [vmem:[#allocation11 + $0xec] ss:$16 sps:$4 sm:$0xff]   ;;  %v882_v31 = vld [vmem:[#allocation11 + $0xe0] ss:$16 sps:$4 sm:$0xff]  }
  0x65   :  { %311 = vmatpush1.bf16.msra.mxu0 %v852_v11  ;;  %352 = vmatpush1.bf16.msra.mxu1 %v853_v12  ;;  %v883_v32 = vld [vmem:[#allocation11 + $0xe8] ss:$16 sps:$4 sm:$0xff]   ;;  %v886_v34 = vld [vmem:[#allocation13 + $0x4] ss:$16 sps:$4 sm:$0xff]   ;;  %v889_v35 = vld [vmem:[#allocation13 + $0xc] ss:$16 sps:$4 sm:$0xff]  }
  0x66   :  { %312 = vmatprep.subr.bf16.mxu0 %v854_v13  ;;  %353 = vmatprep.subr.bf16.mxu1 %v856_v14  ;;  %v884_v36 = vld [vmem:[#allocation13] ss:$16 sps:$4 sm:$0xff]   ;;  %v887_v38 = vld [vmem:[#allocation13 + $0x8] ss:$16 sps:$4 sm:$0xff]   ;;  %v892_v39 = vld [vmem:[#allocation13 + $0x24] ss:$16 sps:$4 sm:$0xff]  }
  0x67   :  { %v895_v40 = vld [vmem:[#allocation13 + $0x2c] ss:$16 sps:$4 sm:$0xff]   ;;  %v890_v41 = vld [vmem:[#allocation13 + $0x20] ss:$16 sps:$4 sm:$0xff]   ;;  %v893_v42 = vld [vmem:[#allocation13 + $0x28] ss:$16 sps:$4 sm:$0xff]  }
  0x68   :  { %v898_v43 = vld [vmem:[#allocation13 + $0x44] ss:$16 sps:$4 sm:$0xff]   ;;  %v901_v44 = vld [vmem:[#allocation13 + $0x4c] ss:$16 sps:$4 sm:$0xff]   ;;  %v896_v45 = vld [vmem:[#allocation13 + $0x40] ss:$16 sps:$4 sm:$0xff]  }
  0x69   :  { %313 = vmatpush1.bf16.msra.mxu0 %v858_v15  ;;  %354 = vmatpush1.bf16.msra.mxu1 %v859_v16  ;;  %v899_v46 = vld [vmem:[#allocation13 + $0x48] ss:$16 sps:$4 sm:$0xff]   ;;  %v904_v47 = vld [vmem:[#allocation13 + $0x64] ss:$16 sps:$4 sm:$0xff]   ;;  %v907_v48 = vld [vmem:[#allocation13 + $0x6c] ss:$16 sps:$4 sm:$0xff]  }
  0x6a   :  { %314 = vmatprep.subr.bf16.mxu0 %v860_v17  ;;  %355 = vmatprep.subr.bf16.mxu1 %v862_v18  ;;  %v902_v49 = vld [vmem:[#allocation13 + $0x60] ss:$16 sps:$4 sm:$0xff]   ;;  %v905_v50 = vld [vmem:[#allocation13 + $0x68] ss:$16 sps:$4 sm:$0xff]   ;;  %v910_v51 = vld [vmem:[#allocation13 + $0x84] ss:$16 sps:$4 sm:$0xff]  }
  0x6b   :  { %v913_v52 = vld [vmem:[#allocation13 + $0x8c] ss:$16 sps:$4 sm:$0xff]   ;;  %v908_v53 = vld [vmem:[#allocation13 + $0x80] ss:$16 sps:$4 sm:$0xff]   ;;  %v911_v54 = vld [vmem:[#allocation13 + $0x88] ss:$16 sps:$4 sm:$0xff]  }
  0x6c   :  { %v916_v55 = vld [vmem:[#allocation13 + $0xa4] ss:$16 sps:$4 sm:$0xff]   ;;  %v919_v56 = vld [vmem:[#allocation13 + $0xac] ss:$16 sps:$4 sm:$0xff]   ;;  %v914_v57 = vld [vmem:[#allocation13 + $0xa0] ss:$16 sps:$4 sm:$0xff]  }
  0x6d   :  { %315 = vmatpush1.bf16.msra.mxu0 %v864_v19  ;;  %356 = vmatpush1.bf16.msra.mxu1 %v865_v20  ;;  %v917_v58 = vld [vmem:[#allocation13 + $0xa8] ss:$16 sps:$4 sm:$0xff]   ;;  %v922_v59 = vld [vmem:[#allocation13 + $0xc4] ss:$16 sps:$4 sm:$0xff]   ;;  %v925_v60 = vld [vmem:[#allocation13 + $0xcc] ss:$16 sps:$4 sm:$0xff]  }
  0x6e   :  { %316 = vmatprep.subr.bf16.mxu0 %v866_v21  ;;  %357 = vmatprep.subr.bf16.mxu1 %v868_v22  ;;  %v920_v61 = vld [vmem:[#allocation13 + $0xc0] ss:$16 sps:$4 sm:$0xff]   ;;  %v923_v62 = vld [vmem:[#allocation13 + $0xc8] ss:$16 sps:$4 sm:$0xff]   ;;  %v928_v63 = vld [vmem:[#allocation13 + $0xe4] ss:$16 sps:$4 sm:$0xff]  }
  0x6f   :  { %v926_v1 = vld [vmem:[#allocation13 + $0xe0] ss:$16 sps:$4 sm:$0xff]   ;;  %v929_v2 = vld [vmem:[#allocation13 + $0xe8] ss:$16 sps:$4 sm:$0xff]   ;;  %v127_v6 = vshrl.u32 %v126_v5, 7 }
  0x70   :  { %v396_v3 = vld [vmem:[#allocation8] sm:$0xff]  ;;  %v124_v8 = vld [vmem:[%s1271_s5] sm:$0xf]  ;;  %s1120_s5 = smov [#allocation15]  }
  0x71   :  { %317 = vmatpush1.bf16.msra.mxu0 %v870_v23  ;;  %358 = vmatpush1.bf16.msra.mxu1 %v871_v24  ;;  %v406_v4 = vpack.c.bf16 %v396_v3, %v396_v3  ;;  %v128_v7 = vsub.s32 0, %v127_v6  ;;  %v132_v9 = vsub.s32 1, %v127_v6  ;;  %v140_v14 = vsub.s32 3, %v127_v6  ;;  %s732_s23 = sshll.u32 %s1120_s5, 4  ;;  %s733_s23 = int_to_ptr.vmem [resolvable:$true] %s732_s23 }
  0x72   :  { %318 = vmatprep.subr.bf16.mxu0 %v872_v25  ;;  %359 = vmatprep.subr.bf16.mxu1 %v874_v26  ;;  %v136_v26 = vsub.s32 2, %v127_v6  ;;  %s1058_s3 = scalar_lea.vmem %s733_s23, 128  ;;  %p1063_p13 = scmp.lt.s32.totalorder %s733_s23, %s733_s23 }
  0x73   :  { %v129_v10 = vrot.slane %v124_v8, %v128_v7  ;;  %v133_v11 = vrot.slane %v124_v8, %v132_v9  ;;  %v141_v25 = vrot.slane %v124_v8, %v140_v14  ;;  %p1059_p12 = scmp.ne.s32.totalorder %s733_s23, %s1058_s3  ;;  %p1064_p0 = scmp.lt.s32.totalorder %s1058_s3, %s1058_s3 }
  0x75   :  { %319 = vmatpush1.bf16.msra.mxu0 %v876_v27  ;;  %360 = vmatpush1.bf16.msra.mxu1 %v877_v28  ;;  %v137_v28 = vrot.slane %v124_v8, %v136_v26  ;;  %p1065_p1 = por %p1064_p0, %p1063_p13 }
  0x76   :  { %320 = vmatprep.subr.bf16.mxu0 %v878_v29  ;;  %361 = vmatprep.subr.bf16.mxu1 %v880_v30 }
  0x77   :  { %p1066_p2 = pnand %p1065_p1, %p1059_p12 }
  0x79   :  { %321 = vmatpush1.bf16.msra.mxu0 %v882_v31  ;;  %362 = vmatpush1.bf16.msra.mxu1 %v883_v32 }
  0x7a   :  { %599 = vmatprep.subr.bf16.mxu0 %v886_v34  ;;  %640 = vmatprep.subr.bf16.mxu1 %v889_v35 }
  0x7c   :  { %339 = vmatmul.mubr.bf16.vlgmr.msra.gmra.mrb[0].mxu0 %v91_v37  ;;  %380 = vmatmul.mubr.bf16.vlgmr.msra.gmra.mrb[0].mxu1 %v91_v37  ;;  %v398_v37 = vld [vmem:[#allocation10] sm:$0xff] }
  0x7d   :  { %600 = vmatpush1.bf16.msra.mxu0 %v884_v36  ;;  %641 = vmatpush1.bf16.msra.mxu1 %v887_v38 }
  0x7e   :  { %601 = vmatprep.subr.bf16.mxu0 %v892_v39  ;;  %642 = vmatprep.subr.bf16.mxu1 %v895_v40 }
  0x7f   :  { %631 = vmatprep.mubr.bf16.mxu0 %v1119_v0  ;;  %672 = vmatprep.mubr.bf16.mxu1 %v1119_v0  ;;  %v931_v0 = vld [vmem:[#allocation13 + $0xec] ss:$16 sps:$4 sm:$0xff]  }
  0x81   :  { %602 = vmatpush1.bf16.msra.mxu0 %v890_v41  ;;  %643 = vmatpush1.bf16.msra.mxu1 %v893_v42 }
  0x82   :  { %603 = vmatprep.subr.bf16.mxu0 %v898_v43  ;;  %644 = vmatprep.subr.bf16.mxu1 %v901_v44 }
  0x85   :  { %604 = vmatpush1.bf16.msra.mxu0 %v896_v45  ;;  %645 = vmatpush1.bf16.msra.mxu1 %v899_v46 }
  0x86   :  { %605 = vmatprep.subr.bf16.mxu0 %v904_v47  ;;  %646 = vmatprep.subr.bf16.mxu1 %v907_v48 }
  0x89   :  { %606 = vmatpush1.bf16.msra.mxu0 %v902_v49  ;;  %647 = vmatpush1.bf16.msra.mxu1 %v905_v50 }
  0x8a   :  { %607 = vmatprep.subr.bf16.mxu0 %v910_v51  ;;  %648 = vmatprep.subr.bf16.mxu1 %v913_v52 }
  0x8d   :  { %608 = vmatpush1.bf16.msra.mxu0 %v908_v53  ;;  %649 = vmatpush1.bf16.msra.mxu1 %v911_v54 }
  0x8e   :  { %609 = vmatprep.subr.bf16.mxu0 %v916_v55  ;;  %650 = vmatprep.subr.bf16.mxu1 %v919_v56 }
  0x91   :  { %610 = vmatpush1.bf16.msra.mxu0 %v914_v57  ;;  %651 = vmatpush1.bf16.msra.mxu1 %v917_v58 }
  0x92   :  { %611 = vmatprep.subr.bf16.mxu0 %v922_v59  ;;  %652 = vmatprep.subr.bf16.mxu1 %v925_v60 }
  0x95   :  { %612 = vmatpush1.bf16.msra.mxu0 %v920_v61  ;;  %653 = vmatpush1.bf16.msra.mxu1 %v923_v62 }
  0x96   :  { %613 = vmatprep.subr.bf16.mxu0 %v928_v63  ;;  %654 = vmatprep.subr.bf16.mxu1 %v931_v0 }
  0x99   :  { %614 = vmatpush1.bf16.msra.mxu0 %v926_v1  ;;  %655 = vmatpush1.bf16.msra.mxu1 %v929_v2 }
  0x9c   :  { %632 = vmatmul.mubr.bf16.vlgmr.msra.gmra.mrb[0].mxu0 %v406_v4  ;;  %673 = vmatmul.mubr.bf16.vlgmr.msra.gmra.mrb[0].mxu1 %v406_v4 }
 0x16f   :  { %v633_v12 = vpop.f32.mrb[0].mxu0  ;;  %v674_v13 = vpop.f32.mrb[0].mxu1 }
 0x170   :  { %v814_v15 = vadd.f32 %v633_v12, %v129_v10  ;;  %v635_v16 = vpop.f32.mrb[1].mxu0  ;;  %v676_v17 = vpop.f32.mrb[1].mxu1  ;;  %v816_v30 = vadd.f32 %v674_v13, %v137_v28 }
 0x171   :  { %v815_v18 = vadd.f32 %v635_v16, %v133_v11  ;;  %v637_v19 = vpop.f32.mrb[2].mxu0  ;;  %v678_v20 = vpop.f32.mrb[2].mxu1  ;;  %v817_v27 = vadd.f32 %v676_v17, %v141_v25 }
 0x172   :  { %v811_v21 = vmul.f32 -1.442695, %v814_v15  ;;  %v638_v22 = vpop.f32.mrb[3].mxu0  ;;  %v679_v23 = vpop.f32.mrb[3].mxu1 }
 0x173   :  { %v812_v24 = vmul.f32 -1.442695, %v815_v18  ;;  %v813_v29 = vmul.f32 -1.442695, %v817_v27 }
 0x174   :  { %932 = vpow2.f32 %v811_v21 }
 0x175   :  { %934 = vpow2.f32 %v812_v24 }
 0x176   :  { %936 = vpow2.f32 %v813_v29 }
 0x177   :  { %938 = vtanh.f32 %v816_v30 }
 0x17e   :  { %v933_v31 = vpop.eup %932 }
 0x17f   :  { %v935_v32 = vpop.eup %934  ;;  %v688_v33 = vadd.f32 1.0, %v933_v31 }
 0x180   :  { %v694_v34 = vadd.f32 1.0, %v935_v32  ;;  %v937_v35 = vpop.eup %936 }
 0x181   :  { %940 = vrcp.f32 %v688_v33  ;;  %v939_v36 = vpop.eup %938  ;;  %v701_v41 = vadd.f32 1.0, %v937_v35 }
 0x182   :  { %942 = vrcp.f32 %v694_v34 }
 0x183   :  { %944 = vrcp.f32 %v701_v41 }
 0x18b   :  { %v941_v38 = vpop.eup %940 }
 0x18c   :  { %v943_v39 = vpop.eup %942  ;;  %v705_v40 = vmul.f32 %v941_v38, %v939_v36 }
 0x18d   :  { %v704_v42 = vmul.f32 %v943_v39, %v398_v37 }
 0x18f   :  { %v706_v43 = vadd.f32 %v705_v40, %v704_v42 }
 0x191   :  { %946 = vtanh.f32 %v706_v43  ;;  %715 = vst [vmem:[#allocation15] sm:$0xff] %v706_v43 }
 0x192   :  { %1069 = shalt.err (!%p1066_p2)
}
 0x193   :  { %s1070_s16 = scalar_lea.hbm %s1273_s7, 128 }
 0x194   :  { %p1071_p3 = scmp.ne.s32.totalorder %s1273_s7, %s1070_s16  ;;  %p1074_p4 = scmp.lt.u32.totalorder %s1070_s16, %s1273_s7 }
 0x196   :  { %p1076_p5 = pnand %p1074_p4, %p1071_p3 }
 0x198   :  { %1079 = shalt.err (!%p1076_p5)
}
 0x199   :  { %735 = dma.vmem_to_hbm [thread:$0]  %s733_s23, 128, %s1273_s7, [#allocation16]   ;;  %v945_v44 = vpop.eup %944 }
 0x19a   :  { %s1121_s24 = smov [#allocation14]  }
 0x19b   :  { %s722_s0 = sshll.u32 %s1121_s24, 4  ;;  %v947_v45 = vpop.eup %946  ;;  %s723_s0 = int_to_ptr.vmem [resolvable:$true] %s722_s0 }
 0x19c   :  { %v708_v46 = vmul.f32 %v947_v45, %v945_v44  ;;  %s1080_s25 = scalar_lea.vmem %s723_s0, 128  ;;  %p1085_p7 = scmp.lt.s32.totalorder %s723_s0, %s723_s0 }
 0x19d   :  { %p1081_p6 = scmp.ne.s32.totalorder %s723_s0, %s1080_s25  ;;  %p1086_p8 = scmp.lt.s32.totalorder %s1080_s25, %s1080_s25 }
 0x19e   :  { %714 = vst [vmem:[#allocation14] sm:$0xff] %v708_v46 }
 0x19f   :  { %p1087_p9 = por %p1086_p8, %p1085_p7 }
 0x1a1   :  { %p1088_p10 = pnand %p1087_p9, %p1081_p6 }
 0x1a3   :  { %1091 = shalt.err (!%p1088_p10)
}
 0x1a4   :  { %s1092_s29 = scalar_lea.hbm %s1272_s6, 128 }
 0x1a5   :  { %p1093_p11 = scmp.ne.s32.totalorder %s1272_s6, %s1092_s29  ;;  %p1096_p12 = scmp.lt.u32.totalorder %s1092_s29, %s1272_s6 }
 0x1a7   :  { %p1098_p13 = pnand %p1096_p12, %p1093_p11 }
 0x1a9   :  { %1101 = shalt.err (!%p1098_p13)
}
 0x1aa   :  { %725 = dma.vmem_to_hbm [thread:$0]  %s723_s0, 128, %s1272_s6, [#allocation7]  }
 0x1ab   :  { %1108 = dma.done.wait [#allocation7], 128  }
 0x1ac   :  { %1109 = vsyncadd [#allocation7], 4294967168 }
 0x1ad   :  { %1110 = dma.done.wait [#allocation16], 128  }
 0x1ae   :  { %1111 = vsyncadd [#allocation16], 4294967168 }
 0x1af   :  { %742 = vsyncpa [#allocation6], 1 }
 0x1b0   :  { %743 = vsyncpa [#allocation9], 1 }
 0x1b1   :  { %744 = vsyncpa [#allocation12], 1 }
 0x1b2   :  { %745 = vsyncpa [#allocation7], 1 }
 0x1b3   :  { %746 = vsyncpa [#allocation16], 1 }

</bundles_post_ra>
